<compile_context>
chip_gen: v7x
topology: tpu7x:2x2x1
jax: 0.10.0
libtpu: 0.0.40
codegen_flags: <defaults>
</compile_context>

<pallas_src>
import functools

import jax
import jax.numpy as jnp
from jax.experimental import pallas as pl
from jax.experimental.pallas import tpu as pltpu


def _parallel_conv_kernel(x_ref, w_ref, b_ref, o_ref):
    # x_ref : (tm, 3*(W+2)*Cin)       im2row LHS tile (dy folded onto K)
    # w_ref : (3*(W+2)*Cin, W*Cout)   banded conv weights, dy stacked on K
    # b_ref : (1, W*Cout)             bias tiled per output column
    # o_ref : (tm, W*Cout)            lane-dense output (last dim = 128 lanes)
    acc = jnp.dot(x_ref[...], w_ref[...], preferred_element_type=jnp.float32)
    o_ref[...] = (acc + b_ref[...].astype(jnp.float32)).astype(o_ref.dtype)


def _build_banded_weights(w3, b3, w1, b1, W):
    """Fold the 1x1 branch into the 3x3 center tap and build the banded rhs.

    Returns
      wcat : (3*(W+2)*Cin, W*Cout) such that
             out[m, w*Cout+co] = lhs[m, :] @ wcat[:, w*Cout+co]
             where lhs[m] is the dy=0,1,2 padded rows of output row m,
             concatenated along K.
      bband: (1, W*Cout)
    """
    # Parallel(conv3x3, conv1x1) == a single 3x3 conv with a modified center tap.
    w3 = w3.at[1, 1].add(w1)
    b = b3 + b1

    _, _, Cin, Cout = w3.shape
    i = jnp.arange(W + 2)[:, None]          # padded-column index of the input
    wcol = jnp.arange(W)[None, :]           # output-column index

    bands = []
    for dy in range(3):
        band = jnp.zeros((W + 2, Cin, W, Cout), w3.dtype)
        for dx in range(3):
            mask = (i == wcol + dx).astype(w3.dtype)                 # (W+2, W)
            band = band + mask[:, None, :, None] * w3[dy, dx][None, :, None, :]
        bands.append(band.reshape((W + 2) * Cin, W * Cout))
    wcat = jnp.concatenate(bands, axis=0)        # (3*(W+2)*Cin, W*Cout)
    bband = jnp.tile(b, W).reshape(1, W * Cout)
    return wcat, bband


def _choose_tile_m(M):
    """Row-tile size along the GEMM M axis (multiple of 8, <= 256)."""
    if M <= 8:
        return M                      # single block equal to the full dim
    if M >= 512:
        return 256                    # big-tile target for v6e/v7x
    # Split into >= 2 row-tiles so v7x's second TensorCore gets a parallel axis.
    half = (((M + 1) // 2) + 7) // 8 * 8
    return max(8, min(256, half))


@functools.partial(jax.jit, static_argnames=("compute_dtype",))
def parallel_forward(x_nchw, w3, b3, w1, b1, compute_dtype=None):
    """x_nchw: (B, Cin, H, W). Returns (B, Cout, H, W), matching PyTorch."""
    B, Cin, H, W = x_nchw.shape
    Cout = w3.shape[-1]
    Kp = (W + 2) * Cin
    K3 = 3 * Kp
    N = W * Cout
    out_dtype = x_nchw.dtype

    # Glue: NCHW -> NHWC, 1-px zero halo, fold (W+2, Cin) onto the lane axis.
    x_nhwc = jnp.transpose(x_nchw, (0, 2, 3, 1))
    x_pad = jnp.pad(x_nhwc, ((0, 0), (1, 1), (1, 1), (0, 0)))
    x2d = x_pad.reshape(B, H + 2, Kp)

    # im2row along dy: each output row carries its 3 padded input rows
    # concatenated along K -> one dense GEMM, batch folded onto M, no
    # sublane-misaligned slices inside the kernel.
    lhs = jnp.concatenate([x2d[:, dy:dy + H, :] for dy in range(3)], axis=-1)
    lhs = lhs.reshape(B * H, K3)

    wcat, bband = _build_banded_weights(w3, b3, w1, b1, W)

    if compute_dtype is not None:  # e.g. jnp.bfloat16 on v6e/v7x (f32 accumulate)
        lhs = lhs.astype(compute_dtype)
        wcat = wcat.astype(compute_dtype)

    M = B * H
    tm = _choose_tile_m(M)
    M_pad = ((M + tm - 1) // tm) * tm
    if M_pad != M:
        lhs = jnp.pad(lhs, ((0, M_pad - M), (0, 0)))

    in_itemsize = jnp.dtype(lhs.dtype).itemsize
    out_itemsize = jnp.dtype(out_dtype).itemsize
    b_itemsize = jnp.dtype(bband.dtype).itemsize

    # Explicit VMEM budget sized from the (double-buffered) blocks, clamped
    # below v7x's 64 MiB physical VMEM.
    block_bytes = (2 * tm * K3 * in_itemsize          # lhs tile
                   + 2 * K3 * N * in_itemsize         # weight slab (grid-invariant)
                   + 2 * 1 * N * b_itemsize           # bias
                   + 2 * tm * N * out_itemsize)       # output tile
    vmem_limit = int(min(48 * 2**20, max(8 * 2**20, 2 * block_bytes)))

    # Note: flops counts the (mostly zero) band entries as real work; fine as
    # an advisory hint at these shapes.
    cost = pl.CostEstimate(
        flops=2 * M_pad * K3 * N,
        transcendentals=0,
        bytes_accessed=(M_pad * K3 * in_itemsize + K3 * N * in_itemsize
                        + N * b_itemsize + M_pad * N * out_itemsize),
    )

    out2d = pl.pallas_call(
        _parallel_conv_kernel,
        out_shape=jax.ShapeDtypeStruct((M_pad, N), out_dtype),
        grid_spec=pltpu.PrefetchScalarGridSpec(
            num_scalar_prefetch=0,
            grid=(M_pad // tm,),
            in_specs=[
                pl.BlockSpec((tm, K3), lambda i: (i, 0)),
                pl.BlockSpec((K3, N), lambda i: (0, 0)),
                pl.BlockSpec((1, N), lambda i: (0, 0)),
            ],
            out_specs=pl.BlockSpec((tm, N), lambda i: (i, 0)),
        ),
        compiler_params=pltpu.CompilerParams(
            dimension_semantics=("parallel",),
            vmem_limit_bytes=vmem_limit),
        cost_estimate=cost,
    )(lhs, wcat, bband)

    # Glue: (M_pad, W*Cout) -> (B, H, W, Cout) -> NCHW.
    out_nhwc = out2d[:M].reshape(B, H, W, Cout)
    return jnp.transpose(out_nhwc, (0, 3, 1, 2))


def _reference(x_nchw, w3, b3, w1, b1):
    """Pure-JAX reference: conv3x3(x) + conv1x1(x), NCHW in/out."""
    x_nhwc = jnp.transpose(x_nchw, (0, 2, 3, 1))
    dn = jax.lax.conv_dimension_numbers(x_nhwc.shape, w3.shape,
                                        ("NHWC", "HWIO", "NHWC"))
    y3 = jax.lax.conv_general_dilated(x_nhwc, w3, (1, 1), "SAME",
                                      dimension_numbers=dn) + b3
    w1_4d = w1.reshape(1, 1, w1.shape[0], w1.shape[1])
    y1 = jax.lax.conv_general_dilated(x_nhwc, w1_4d, (1, 1), "SAME",
                                      dimension_numbers=dn) + b1
    return jnp.transpose(y3 + y1, (0, 3, 1, 2))


if __name__ == "__main__":
    B, Cin, Cout, H, W = 2, 4, 8, 16, 16

    key = jax.random.PRNGKey(0)
    kx, kw3, kb3, kw1, kb1 = jax.random.split(key, 5)

    x = jax.random.normal(kx, (B, Cin, H, W), jnp.float32)
    # Deterministic "parameter init" (shapes match nn.Conv2d weights, HWIO).
    w3 = jax.random.normal(kw3, (3, 3, Cin, Cout), jnp.float32) * 0.1
    b3 = jax.random.normal(kb3, (Cout,), jnp.float32) * 0.1
    w1 = jax.random.normal(kw1, (Cin, Cout), jnp.float32) * 0.1
    b1 = jax.random.normal(kb1, (Cout,), jnp.float32) * 0.1

    ref = jax.block_until_ready(_reference(x, w3, b3, w1, b1))

    # Default f32 path: exact parity with the PyTorch reference.
    out = jax.block_until_ready(parallel_forward(x, w3, b3, w1, b1))
    assert out.shape == (B, Cout, H, W)
    assert jnp.allclose(out, ref, atol=1e-4, rtol=1e-4), "f32 mismatch vs reference"

    # bf16 MXU path (v6e/v7x rate, f32 accumulation): looser tolerance.
    out_bf16 = jax.block_until_ready(
        parallel_forward(x, w3, b3, w1, b1, compute_dtype=jnp.bfloat16))
    assert out_bf16.shape == (B, Cout, H, W)
    assert jnp.allclose(out_bf16, ref, atol=5e-2, rtol=5e-2), "bf16 mismatch vs reference"

    print("KERNEL_OK")
</pallas_src>

<mosaic_0001>
module attributes {stable_mosaic.version = 11 : i64} {
  func.func @_parallel_conv_kernel(%arg0: i32, %arg1: memref<16x216xf32, #tpu.memory_space<vmem>>, %arg2: memref<216x128xf32, #tpu.memory_space<vmem>>, %arg3: memref<1x128xf32, #tpu.memory_space<vmem>>, %arg4: memref<16x128xf32, #tpu.memory_space<vmem>>) attributes {dimension_semantics = [#tpu.dimension_semantics<parallel>], iteration_bounds = array<i64: 2>, scalar_prefetch = 0 : i64, scratch_operands = 0 : i64, tpu.core_type = #tpu.core_type<tc>, window_params = [{transform_indices = @transform_0, window_bounds = array<i64: 16, 216>}, {pipeline_mode = #tpu.pipeline_mode<synchronous>, transform_indices = @transform_1, window_bounds = array<i64: 216, 128>}, {pipeline_mode = #tpu.pipeline_mode<synchronous>, transform_indices = @transform_2, window_bounds = array<i64: 1, 128>}, {transform_indices = @transform_3, window_bounds = array<i64: 16, 128>}]} {
    %c0 = arith.constant 0 : index
    %c0_0 = arith.constant 0 : index
    %0 = vector.load %arg1[%c0, %c0_0] : memref<16x216xf32, #tpu.memory_space<vmem>>, vector<16x216xf32>
    %c0_1 = arith.constant 0 : index
    %c0_2 = arith.constant 0 : index
    %1 = vector.load %arg2[%c0_1, %c0_2] : memref<216x128xf32, #tpu.memory_space<vmem>>, vector<216x128xf32>
    %cst = arith.constant dense<0.000000e+00> : vector<16x128xf32>
    %2 = tpu.matmul %0, %1, %cst {dimension_numbers = #tpu.dot_dimension_numbers<[1], [0], [0], [1], [0, 0, 1, 1], [], []>} : vector<16x216xf32>, vector<216x128xf32>, vector<16x128xf32> -> vector<16x128xf32>
    %c0_3 = arith.constant 0 : index
    %c0_4 = arith.constant 0 : index
    %3 = vector.load %arg3[%c0_3, %c0_4] : memref<1x128xf32, #tpu.memory_space<vmem>>, vector<1x128xf32>
    %4 = vector.broadcast %3 : vector<1x128xf32> to vector<16x128xf32>
    %5 = arith.addf %2, %4 : vector<16x128xf32>
    %c0_5 = arith.constant 0 : index
    %c0_6 = arith.constant 0 : index
    %6 = vector.load %arg4[%c0_5, %c0_6] : memref<16x128xf32, #tpu.memory_space<vmem>>, vector<16x128xf32>
    tpu.vector_store %arg4[%c0_5, %c0_6], %5 {strides = array<i32>} : memref<16x128xf32, #tpu.memory_space<vmem>>, vector<16x128xf32>,
    return
  }
  func.func @transform_0(%arg0: i32) -> (i32, i32) {
    %c0_i32 = arith.constant 0 : i32
    %c0_i32_0 = arith.constant 0 : i32
    return %arg0, %c0_i32 : i32, i32
  }
  func.func @transform_1(%arg0: i32) -> (i32, i32) {
    %c0_i32 = arith.constant 0 : i32
    %c0_i32_0 = arith.constant 0 : i32
    %c0_i32_1 = arith.constant 0 : i32
    return %c0_i32, %c0_i32_0 : i32, i32
  }
  func.func @transform_2(%arg0: i32) -> (i32, i32) {
    %c0_i32 = arith.constant 0 : i32
    %c0_i32_0 = arith.constant 0 : i32
    %c0_i32_1 = arith.constant 0 : i32
    return %c0_i32, %c0_i32_0 : i32, i32
  }
  func.func @transform_3(%arg0: i32) -> (i32, i32) {
    %c0_i32 = arith.constant 0 : i32
    %c0_i32_0 = arith.constant 0 : i32
    return %arg0, %c0_i32 : i32, i32
  }
}

</mosaic_0001>

<bundles_post_ra>
// kernel: tile.8
= control target key start
LH: loop header
LB: loop body
LE: loop exit
PB: predicated region body
PF: predicated region fallthrough
CT: control target
= control target key end

     0   :  { %s28_s0 = inlined_call_operand.vmem [shape: f32[8], index: 0, kind: input, shape index: {}]   ;;  %s29_s1 = inlined_call_operand.vmem [shape: f32[16,8], index: 1, kind: output, shape index: {}]  }
   0x1   :  { %v4_v0 = vld [vmem:[%s28_s0] ss:$0 sm:$0xff] }
   0x2   :  { %5 = vst [vmem:[%s29_s1] sm:$0xff] %v4_v0  ;;  %8 = vst [vmem:[%s29_s1 + $0x8] sm:$0xff] %v4_v0 }

// kernel: tile.9
= control target key start
LH: loop header
LB: loop body
LE: loop exit
PB: predicated region body
PF: predicated region fallthrough
CT: control target
= control target key end

     0   :  { %s131_s10 = smov 120   ;;  %s132_s11 = smov 104   ;;  %vm3_vm0 = vcmask 64512   ;;  %vm9_vm1 = vcmask 1048512   ;;  %vm15_vm2 = vcmask 982912   ;;  %vm21_vm3 = vcmask 917312   ;;  %s207_s0 = inlined_call_operand.vmem [shape: f32[16,8], index: 0, kind: input, shape index: {}]   ;;  %s208_s1 = inlined_call_operand.vmem [shape: f32[1,128], index: 1, kind: output, shape index: {}]  }
   0x1   :  { %v101_v0 = vld [vmem:[%s207_s0 + $0xf] sm:$0x1]   ;;  %v103_v1 = vld [vmem:[%s207_s0 + $0xd] sm:$0x1]   ;;  %v102_v2 = vld [vmem:[%s207_s0 + $0xe] sm:$0x1]  }
   0x2   :  { %7 = vrot.lane.b32.xlu0 %v101_v0, %s131_s10  ;;  %19 = vrot.lane.b32.xlu1 %v103_v1, %s132_s11  ;;  %v104_v3 = vld [vmem:[%s207_s0 + $0xc] sm:$0x1]   ;;  %s133_s16 = smov 112   ;;  %s134_s17 = smov 96   ;;  %v105_v4 = vld [vmem:[%s207_s0 + $0xb] sm:$0x1]  }
   0x3   :  { %v106_v5 = vld [vmem:[%s207_s0 + $0xa] sm:$0x1]   ;;  %v2_v6 = vld [vmem:[%s207_s0] sm:$0x1]   ;;  %s135_s24 = smov 88   ;;  %s136_s25 = smov 80  }
   0x4   :  { %4 = vst.msk [vmem:[#allocation0] sm:$0x1] %vm3_vm0, %v2_v6   ;;  %v107_v7 = vld [vmem:[%s207_s0 + $0x9] sm:$0x1]   ;;  %v108_v8 = vld [vmem:[%s207_s0 + $0x8] sm:$0x1]  }
   0x5   :  { %s137_s30 = smov 72   ;;  %s138_s2 = smov 64   ;;  %v109_v9 = vld [vmem:[%s207_s0 + $0x7] sm:$0x1]   ;;  %v110_v10 = vld [vmem:[%s207_s0 + $0x6] sm:$0x1]  }
   0x6   :  { %13 = vrot.lane.b32.xlu0 %v102_v2, %s133_s16  ;;  %25 = vrot.lane.b32.xlu1 %v104_v3, %s134_s17  ;;  %s139_s7 = smov 56   ;;  %s140_s8 = smov 48   ;;  %v111_v11 = vld [vmem:[%s207_s0 + $0x5] sm:$0x1]   ;;  %v112_v12 = vld [vmem:[%s207_s0 + $0x4] sm:$0x1]  }
   0x7   :  { %s141_s13 = smov 40   ;;  %s142_s14 = smov 32   ;;  %v113_v13 = vld [vmem:[%s207_s0 + $0x3] sm:$0x1]   ;;  %v114_v14 = vld [vmem:[%s207_s0 + $0x2] sm:$0x1]  }
   0x8   :  { %s143_s19 = smov 24   ;;  %s144_s20 = smov 16   ;;  %v115_v15 = vld [vmem:[%s207_s0 + $0x1] sm:$0x1]   ;;  %vm27_vm4 = vcmask 851712   ;;  %vm33_vm5 = vcmask 786112  }
   0x9   :  { %s145_s0 = smov 8   ;;  %vm39_vm6 = vcmask 720512   ;;  %vm45_vm7 = vcmask 654912   ;;  %vm51_vm8 = vcmask 589312   ;;  %vm57_vm9 = vcmask 523712  }
   0xa   :  { %31 = vrot.lane.b32.xlu0 %v105_v4, %s135_s24  ;;  %37 = vrot.lane.b32.xlu1 %v106_v5, %s136_s25  ;;  %vm63_vm10 = vcmask 458112   ;;  %vm69_vm11 = vcmask 392512   ;;  %vm75_vm12 = vcmask 326912   ;;  %vm81_vm13 = vcmask 261312  }
   0xb   :  { %vm87_vm14 = vcmask 195712   ;;  %vm93_vm15 = vcmask 130112  }
   0xe   :  { %43 = vrot.lane.b32.xlu0 %v107_v7, %s137_s30  ;;  %49 = vrot.lane.b32.xlu1 %v108_v8, %s138_s2 }
  0x12   :  { %55 = vrot.lane.b32.xlu0 %v109_v9, %s139_s7  ;;  %61 = vrot.lane.b32.xlu1 %v110_v10, %s140_s8 }
  0x16   :  { %67 = vrot.lane.b32.xlu0 %v111_v11, %s141_s13  ;;  %73 = vrot.lane.b32.xlu1 %v112_v12, %s142_s14 }
  0x1a   :  { %79 = vrot.lane.b32.xlu0 %v113_v13, %s143_s19  ;;  %85 = vrot.lane.b32.xlu1 %v114_v14, %s144_s20 }
  0x1e   :  { %91 = vrot.lane.b32.xlu0 %v115_v15, %s145_s0 }
  0x74   :  { %v8_v16 = vpop.permute.xlu0 %7   ;;  %v20_v17 = vpop.permute.xlu1 %19  }
  0x75   :  { %10 = vst.msk [vmem:[#allocation0] sm:$0x1] %vm9_vm1, %v8_v16  }
  0x78   :  { %v14_v18 = vpop.permute.xlu0 %13   ;;  %v26_v19 = vpop.permute.xlu1 %25  }
  0x79   :  { %16 = vst.msk [vmem:[#allocation0] sm:$0x1] %vm15_vm2, %v14_v18  }
  0x7a   :  { %22 = vst.msk [vmem:[#allocation0] sm:$0x1] %vm21_vm3, %v20_v17  }
  0x7b   :  { %28 = vst.msk [vmem:[#allocation0] sm:$0x1] %vm27_vm4, %v26_v19  }
  0x7c   :  { %v32_v20 = vpop.permute.xlu0 %31   ;;  %v38_v21 = vpop.permute.xlu1 %37  }
  0x7d   :  { %34 = vst.msk [vmem:[#allocation0] sm:$0x1] %vm33_vm5, %v32_v20  }
  0x7e   :  { %40 = vst.msk [vmem:[#allocation0] sm:$0x1] %vm39_vm6, %v38_v21  }
  0x80   :  { %v44_v22 = vpop.permute.xlu0 %43   ;;  %v50_v23 = vpop.permute.xlu1 %49  }
  0x81   :  { %46 = vst.msk [vmem:[#allocation0] sm:$0x1] %vm45_vm7, %v44_v22  }
  0x82   :  { %52 = vst.msk [vmem:[#allocation0] sm:$0x1] %vm51_vm8, %v50_v23  }
  0x84   :  { %v56_v24 = vpop.permute.xlu0 %55   ;;  %v62_v25 = vpop.permute.xlu1 %61  }
  0x85   :  { %58 = vst.msk [vmem:[#allocation0] sm:$0x1] %vm57_vm9, %v56_v24  }
  0x86   :  { %64 = vst.msk [vmem:[#allocation0] sm:$0x1] %vm63_vm10, %v62_v25  }
  0x88   :  { %v68_v26 = vpop.permute.xlu0 %67   ;;  %v74_v27 = vpop.permute.xlu1 %73  }
  0x89   :  { %70 = vst.msk [vmem:[#allocation0] sm:$0x1] %vm69_vm11, %v68_v26  }
  0x8a   :  { %76 = vst.msk [vmem:[#allocation0] sm:$0x1] %vm75_vm12, %v74_v27  }
  0x8c   :  { %v80_v28 = vpop.permute.xlu0 %79   ;;  %v86_v29 = vpop.permute.xlu1 %85  }
  0x8d   :  { %82 = vst.msk [vmem:[#allocation0] sm:$0x1] %vm81_vm13, %v80_v28  }
  0x8e   :  { %88 = vst.msk [vmem:[#allocation0] sm:$0x1] %vm87_vm14, %v86_v29  }
  0x90   :  { %v92_v30 = vpop.permute.xlu0 %91  }
  0x91   :  { %94 = vst.msk [vmem:[#allocation0] sm:$0x1] %vm93_vm15, %v92_v30  }
  0x98   :  { %v98_v31 = vld [vmem:[#allocation0] sm:$0x1] }
  0x99   :  { %100 = vst [vmem:[%s208_s1] sm:$0x1] %v98_v31 }

// kernel: parallel_forward.1
= control target key start
LH: loop header
LB: loop body
LE: loop exit
PB: predicated region body
PF: predicated region fallthrough
CT: control target
= control target key end

     0   :  { %s478_s12 = smov 0   ;;  %s615_s0 = inlined_call_operand.vmem [shape: f32[32,216], index: 0, kind: input, shape index: {}]   ;;  %s616_s1 = inlined_call_operand.vmem [shape: f32[216,128], index: 1, kind: input, shape index: {}]   ;;  %s617_s2 = inlined_call_operand.vmem [shape: f32[1,128], index: 2, kind: input, shape index: {}]   ;;  %s618_s3 = inlined_call_operand.vmem [shape: f32[32,128], index: 3, kind: output, shape index: {}]  }
   0x1 LB: > { %s355_s13 = sadd.s32 4294967295, %s454_s12   ;;  %p359_p0 = scmp.ge.s32.totalorder %s454_s12, 1  ;;  %s454_s12 = sphi %s478_s12, %s13_s12  }
   0x2   : > { %p139_p1 = scmp.lt.s32.totalorder %s454_s12, 3 }
   0x4   : > { %p140_p2 = pnand %p359_p0, %p139_p1 }
   0x5   : > { %v181_v0 = vld [vmem:[%s616_s1] sm:$0xff] (!%p140_p2)  ;;  %v182_v1 = vld [vmem:[%s616_s1 + $0x8] sm:$0xff] (!%p140_p2)  ;;  %v183_v2 = vld [vmem:[%s616_s1 + $0x10] sm:$0xff] (!%p140_p2)  ;;  %s360_s20 = sshll.u32 (!%p140_p2), %s355_s13, 1  ;;  %v456_v3 = vmov (!%p140_p2), 0.0|0.0   ;;  %vm215_vm0 = vcmask (!%p140_p2), 719872  }
   0x6   : > { %143 = sbr.rel (%p140_p2) target bundleno = 276 (0x114), region = 32  ;;  %371 = vmatprep.subr.bf16.mxu0 (!%p140_p2), %v456_v3  ;;  %410 = vmatprep.subr.bf16.mxu1 (!%p140_p2), %v456_v3  ;;  %v372_v4 = vpack.c.bf16 (!%p140_p2), %v182_v1, %v181_v0  ;;  %v184_v5 = vld [vmem:[%s616_s1 + $0x18] sm:$0xff] (!%p140_p2)  ;;  %p165_p3 = scmp.lt.s32.totalorder (!%p140_p2), %s360_s20, 3  ;;  %v185_v7 = vld [vmem:[%s616_s1 + $0x20] sm:$0xff] (!%p140_p2)  ;;  %v186_v8 = vld [vmem:[%s616_s1 + $0x28] sm:$0xff] (!%p140_p2)  ;;  %v457_v42 = vmov (!%p140_p2), 0.0  }
   0x7   : > { %v375_v6 = vpack.c.bf16 (!%p140_p2), %v184_v5, %v183_v2  ;;  %v378_v9 = vpack.c.bf16 (!%p140_p2), %v186_v8, %v185_v7  ;;  %v187_v10 = vld [vmem:[%s616_s1 + $0x30] sm:$0xff] (!%p140_p2)  ;;  %v188_v11 = vld [vmem:[%s616_s1 + $0x38] sm:$0xff] (!%p140_p2)  ;;  %v189_v15 = vld [vmem:[%s616_s1 + $0x40] sm:$0xff] (!%p140_p2) }
   0x8   : > { %373 = vmatpush1.bf16.msra.mxu0 (!%p140_p2), %v372_v4  ;;  %424 = vmatpush1.bf16.msra.mxu1 (!%p140_p2), %v372_v4  ;;  %v381_v14 = vpack.c.bf16 (!%p140_p2), %v188_v11, %v187_v10  ;;  %v190_v16 = vld [vmem:[%s616_s1 + $0x48] sm:$0xff] (!%p140_p2)  ;;  %v191_v18 = vld [vmem:[%s616_s1 + $0x50] sm:$0xff] (!%p140_p2)  ;;  %v192_v19 = vld [vmem:[%s616_s1 + $0x58] sm:$0xff] (!%p140_p2) }
   0x9   : > { %374 = vmatprep.subr.bf16.mxu0 (!%p140_p2), %v456_v3  ;;  %411 = vmatprep.subr.bf16.mxu1 (!%p140_p2), %v456_v3  ;;  %v384_v17 = vpack.c.bf16 (!%p140_p2), %v190_v16, %v189_v15  ;;  %v387_v20 = vpack.c.bf16 (!%p140_p2), %v192_v19, %v191_v18  ;;  %v193_v21 = vld [vmem:[%s616_s1 + $0x60] sm:$0xff] (!%p140_p2)  ;;  %v194_v22 = vld [vmem:[%s616_s1 + $0x68] sm:$0xff] (!%p140_p2)  ;;  %v195_v24 = vld [vmem:[%s616_s1 + $0x70] sm:$0xff] (!%p140_p2) }
   0xa   : > { %v390_v23 = vpack.c.bf16 (!%p140_p2), %v194_v22, %v193_v21  ;;  %v196_v25 = vld [vmem:[%s616_s1 + $0x78] sm:$0xff] (!%p140_p2)  ;;  %v197_v27 = vld [vmem:[%s616_s1 + $0x80] sm:$0xff] (!%p140_p2)  ;;  %v198_v28 = vld [vmem:[%s616_s1 + $0x88] sm:$0xff] (!%p140_p2) }
   0xb   : > { %v393_v26 = vpack.c.bf16 (!%p140_p2), %v196_v25, %v195_v24  ;;  %v396_v29 = vpack.c.bf16 (!%p140_p2), %v198_v28, %v197_v27  ;;  %v199_v30 = vld [vmem:[%s616_s1 + $0x90] sm:$0xff] (!%p140_p2)  ;;  %v200_v31 = vld [vmem:[%s616_s1 + $0x98] sm:$0xff] (!%p140_p2)  ;;  %v201_v33 = vld [vmem:[%s616_s1 + $0xa0] sm:$0xff] (!%p140_p2) }
   0xc   : > { %376 = vmatpush1.bf16.msra.mxu0 (!%p140_p2), %v375_v6  ;;  %425 = vmatpush1.bf16.msra.mxu1 (!%p140_p2), %v375_v6  ;;  %v399_v32 = vpack.c.bf16 (!%p140_p2), %v200_v31, %v199_v30  ;;  %v202_v34 = vld [vmem:[%s616_s1 + $0xa8] sm:$0xff] (!%p140_p2)  ;;  %v203_v36 = vld [vmem:[%s616_s1 + $0xb0] sm:$0xff] (!%p140_p2)  ;;  %v204_v37 = vld [vmem:[%s616_s1 + $0xb8] sm:$0xff] (!%p140_p2) }
   0xd   : > { %s620_s20 = smov (!%p165_p3, %s360_s20), 3  ;;  %377 = vmatprep.subr.bf16.mxu0 %v456_v3  ;;  %412 = vmatprep.subr.bf16.mxu1 %v456_v3  ;;  %v402_v35 = vpack.c.bf16 %v202_v34, %v201_v33  ;;  %v405_v38 = vpack.c.bf16 %v204_v37, %v203_v36  ;;  %v205_v39 = vld [vmem:[%s616_s1 + $0xc0] sm:$0xff]  ;;  %v206_v40 = vld [vmem:[%s616_s1 + $0xc8] sm:$0xff]  ;;  %v207_v43 = vld [vmem:[%s616_s1 + $0xd0] sm:$0xff] }
   0xe   : > { %s370_s27 = sshll.u32 %s620_s20, 4  ;;  %v408_v41 = vpack.c.bf16 %v206_v40, %v205_v39  ;;  %s364_s24 = sshll.u32 %s620_s20, 3  ;;  %v365_v46 = vld [vmem:[%s617_s2] ss:$0 sm:$0xff] }
   0xf   : > { %s514_s30 = scalar_lea.vmem %s615_s0, %s370_s27  ;;  %s175_s29 = scalar_lea.vmem %s618_s3, %s364_s24 }
  0x10   : > { %v178_v12 = vld [vmem:[%s514_s30 + $0x8] sm:$0xff]  ;;  %v180_v13 = vld [vmem:[%s514_s30 + $0x18] sm:$0xff]  ;;  %379 = vmatpush1.bf16.msra.mxu0 %v378_v9  ;;  %426 = vmatpush1.bf16.msra.mxu1 %v378_v9  ;;  %v177_v44 = vld [vmem:[%s514_s30] sm:$0xff] }
  0x11   : > { %366 = vmatprep.mubr.msk.f32.mxu0 %vm215_vm0, %v178_v12  ;;  %367 = vmatprep.mubr.msk.f32.mxu1 %vm215_vm0, %v180_v13  ;;  %v179_v45 = vld [vmem:[%s514_s30 + $0x10] sm:$0xff] }
  0x12   : > { %380 = vmatprep.subr.bf16.mxu0 %v456_v3  ;;  %413 = vmatprep.subr.bf16.mxu1 %v456_v3 }
  0x14   : > { %382 = vmatpush1.bf16.msra.mxu0 %v381_v14  ;;  %427 = vmatpush1.bf16.msra.mxu1 %v381_v14 }
  0x15   : > { %383 = vmatprep.subr.bf16.mxu0 %v456_v3  ;;  %414 = vmatprep.subr.bf16.mxu1 %v456_v3 }
  0x18   : > { %385 = vmatpush1.bf16.msra.mxu0 %v384_v17  ;;  %428 = vmatpush1.bf16.msra.mxu1 %v384_v17 }
  0x19   : > { %386 = vmatprep.subr.bf16.mxu0 %v456_v3  ;;  %415 = vmatprep.subr.bf16.mxu1 %v456_v3 }
  0x1c   : > { %388 = vmatpush1.bf16.msra.mxu0 %v387_v20  ;;  %429 = vmatpush1.bf16.msra.mxu1 %v387_v20 }
  0x1d   : > { %389 = vmatprep.subr.bf16.mxu0 %v456_v3  ;;  %416 = vmatprep.subr.bf16.mxu1 %v456_v3 }
  0x20   : > { %391 = vmatpush1.bf16.msra.mxu0 %v390_v23  ;;  %430 = vmatpush1.bf16.msra.mxu1 %v390_v23 }
  0x21   : > { %392 = vmatprep.subr.bf16.mxu0 %v456_v3  ;;  %417 = vmatprep.subr.bf16.mxu1 %v456_v3 }
  0x24   : > { %394 = vmatpush1.bf16.msra.mxu0 %v393_v26  ;;  %431 = vmatpush1.bf16.msra.mxu1 %v393_v26 }
  0x25   : > { %395 = vmatprep.subr.bf16.mxu0 %v456_v3  ;;  %418 = vmatprep.subr.bf16.mxu1 %v456_v3 }
  0x28   : > { %397 = vmatpush1.bf16.msra.mxu0 %v396_v29  ;;  %432 = vmatpush1.bf16.msra.mxu1 %v396_v29 }
  0x29   : > { %398 = vmatprep.subr.bf16.mxu0 %v456_v3  ;;  %419 = vmatprep.subr.bf16.mxu1 %v456_v3 }
  0x2c   : > { %400 = vmatpush1.bf16.msra.mxu0 %v399_v32  ;;  %433 = vmatpush1.bf16.msra.mxu1 %v399_v32 }
  0x2d   : > { %401 = vmatprep.subr.bf16.mxu0 %v456_v3  ;;  %420 = vmatprep.subr.bf16.mxu1 %v456_v3 }
  0x30   : > { %403 = vmatpush1.bf16.msra.mxu0 %v402_v35  ;;  %434 = vmatpush1.bf16.msra.mxu1 %v402_v35 }
  0x31   : > { %404 = vmatprep.subr.bf16.mxu0 %v456_v3  ;;  %421 = vmatprep.subr.bf16.mxu1 %v456_v3 }
  0x34   : > { %406 = vmatpush1.bf16.msra.mxu0 %v405_v38  ;;  %435 = vmatpush1.bf16.msra.mxu1 %v405_v38 }
  0x35   : > { %407 = vmatprep.subr.bf16.mxu0 %v456_v3  ;;  %422 = vmatprep.subr.bf16.mxu1 %v456_v3 }
  0x38   : > { %409 = vmatpush1.bf16.msra.mxu0 %v408_v41  ;;  %436 = vmatpush1.bf16.msra.mxu1 %v408_v41 }
  0x39   : > { %274 = vmatprep.subr.mxu0 %v457_v42  ;;  %423 = vmatprep.subr.mxu1 %v457_v42 }
  0x3c   : > { %275 = vmatpush1.msra.mxu0 %v207_v43  ;;  %437 = vmatpush1.msra.mxu1 %v207_v43 }
  0x3d   : > { %287 = vmatmul.mubr.f32.vlgmr.msra.gmra.mrb[0].mxu0 %v177_v44  ;;  %292 = vmatmul.mubr.f32.vlgmr.msra.gmra.mrb[0].mxu1 %v179_v45 }
 0x110   : > { %v288_v47 = vpop.f32.mrb[0].mxu0  ;;  %v293_v48 = vpop.f32.mrb[0].mxu1 }
 0x111   : > { %v289_v49 = vadd.f32 %v365_v46, %v288_v47  ;;  %v294_v50 = vadd.f32 %v365_v46, %v293_v48  ;;  %v290_v51 = vpop.f32.mrb[1].mxu0  ;;  %v295_v52 = vpop.f32.mrb[1].mxu1 }
 0x113   : > { %297 = vst [vmem:[%s175_s29] sm:$0xff] %v289_v49  ;;  %298 = vst [vmem:[%s175_s29 + $0x8] sm:$0xff] %v294_v50 }
 0x114 PF: > { %s13_s12 = sadd.s32 1, %s454_s12  }
 0x115   : > { %p10_p4 = scmp.ge.s32.totalorder %s13_s12, 4  }
 0x117   :  { %12 = sbr.rel (!%p10_p4) target bundleno = 1 (0x1), region = 62 }

</bundles_post_ra>
